<compile_context>
chip_gen: v7x
topology: tpu7x:2x2x1
jax: 0.10.0
libtpu: 0.0.40
codegen_flags: <defaults>
</compile_context>

<pallas_src>
import functools

import jax
import jax.numpy as jnp
import numpy as np
from jax import lax
from jax.experimental import pallas as pl
from jax.experimental.pallas import tpu as pltpu


# ------------------------------ Pallas kernel ------------------------------ #

def _midblock_kernel(x_ref, scale_ref, bias_ref, w_ref, o_ref, pad_ref, *,
                     H, WC):
    """Fused MidBlock forward for one image.

    x_ref:     (H, W*C)          activation slab (row-major flatten of (H,W,C))
    scale_ref: (4, W*C)          fused eval-mode BN scale per stage (tiled over W)
    bias_ref:  (4, W*C)          fused BN bias per stage
    w_ref:     (4, 3, W*C, W*C)  bf16 banded conv weights, indexed [stage, dy]
    o_ref:     (H, W*C)
    pad_ref:   (H+2, W*C) f32    scratch; rows 0 and H+1 are the zero y-halo
    """
    # Zero only the y-halo rows; interior rows are fully overwritten each stage.
    zero_row = jnp.zeros((1, WC), jnp.float32)
    pad_ref[0:1, :] = zero_row
    pad_ref[H + 1:H + 2, :] = zero_row

    def conv_stage(t, s):
        # conv_s(relu(bn_s(t))), 3x3 / stride 1 / pad 1 (x-pad folded into band).
        act = jnp.maximum(t * scale_ref[s:s + 1, :] + bias_ref[s:s + 1, :], 0.0)
        pad_ref[1:H + 1, :] = act
        acc = jnp.zeros((H, WC), jnp.float32)
        for dy in range(3):  # one (H, W*C) x (W*C, W*C) bf16 matmul per dy
            acc = acc + jnp.dot(pad_ref[dy:dy + H, :].astype(jnp.bfloat16),
                                w_ref[s, dy],
                                preferred_element_type=jnp.float32)
        return acc

    x = x_ref[...]
    t = conv_stage(x, 0)                    # conv1(relu(bn1(x)))
    t = conv_stage(t, 1)                    # conv2(relu(bn2(.)))
    u = conv_stage(0.5 * t + x, 2)          # conv3(relu(bn3(0.5*out + shortcut)))
    u = conv_stage(u, 3)                    # conv4(relu(bn4(.)))
    o_ref[...] = jnp.maximum(u + x, 0.0)    # relu(out + shortcut)


# ------------------------------ call wrapper ------------------------------- #

def _band_weight(w_hwio, W):
    """(3,3,Cin,Cout) HWIO -> (3, W*Cin, W*Cout) banded matrices.

    band[dy][xi*C + ci, xo*C + co] = w[dy, xi-xo+1, ci, co]  (0 <= xi-xo+1 < 3)
    so that   out[y] = sum_dy padded_rows[y+dy] @ band[dy]
    reproduces the 3x3 conv with zero x-padding folded in.
    """
    # bf16-round the weights once so kernel and reference share operands.
    wb = w_hwio.astype(jnp.bfloat16).astype(jnp.float32)
    bands = []
    for dy in range(3):
        band = jnp.zeros((W * wb.shape[2], W * wb.shape[3]), jnp.float32)
        for dx in range(3):
            band = band + jnp.kron(
                jnp.eye(W, W, k=1 - dx, dtype=jnp.float32), wb[dy, dx])
        bands.append(band)
    return jnp.stack(bands).astype(jnp.bfloat16)


@jax.jit
def midblock_forward(x_nchw, params):
    """PyTorch-equivalent MidBlock forward.  x_nchw: (N,C,H,W) -> (N,C,H,W)."""
    N, C, H, W = x_nchw.shape
    WC = W * C
    x = jnp.transpose(x_nchw, (0, 2, 3, 1)).reshape(N, H, WC)   # NCHW -> (N,H,W*C)

    # Pre-reshaped, lane-friendly weights / folded-BN params (trace-time only).
    wband = jnp.stack([_band_weight(params[f'w{i}'], W) for i in range(1, 5)])
    scales = jnp.stack([jnp.tile(params[f'scale{i}'], W) for i in range(1, 5)])
    biases = jnp.stack([jnp.tile(params[f'bias{i}'], W) for i in range(1, 5)])

    kernel = functools.partial(_midblock_kernel, H=H, WC=WC)
    out = pl.pallas_call(
        kernel,
        out_shape=jax.ShapeDtypeStruct((N, H, WC), jnp.float32),
        grid=(N,),
        in_specs=[
            pl.BlockSpec((pl.Squeezed(), H, WC), lambda n: (n, 0, 0)),
            pl.BlockSpec((4, WC), lambda n: (0, 0)),
            pl.BlockSpec((4, WC), lambda n: (0, 0)),
            pl.BlockSpec((4, 3, WC, WC), lambda n: (0, 0, 0, 0)),
        ],
        out_specs=pl.BlockSpec((pl.Squeezed(), H, WC), lambda n: (n, 0, 0)),
        scratch_shapes=[pltpu.VMEM((H + 2, WC), jnp.float32)],
        compiler_params=pltpu.CompilerParams(
            dimension_semantics=("parallel",)),   # v7x: shard batch over 2 TCs
    )(x, scales, biases, wband)

    return jnp.transpose(out.reshape(N, H, W, C), (0, 3, 1, 2))   # -> NCHW


# ---------------------------- pure-JAX reference ---------------------------- #

def ref_forward(x_nchw, params):
    x = jnp.transpose(x_nchw, (0, 2, 3, 1))
    sc = x

    def stage(t, i):   # conv_i(relu(bn_i(t))), bf16 conv with f32 accumulation
        a = jnp.maximum(t * params[f'scale{i}'] + params[f'bias{i}'], 0.0)
        return lax.conv_general_dilated(
            a.astype(jnp.bfloat16), params[f'w{i}'].astype(jnp.bfloat16),
            (1, 1), ((1, 1), (1, 1)),
            dimension_numbers=('NHWC', 'HWIO', 'NHWC'),
            preferred_element_type=jnp.float32)

    t = stage(stage(x, 1), 2)
    u = stage(stage(0.5 * t + sc, 3), 4)
    out = jnp.maximum(u + sc, 0.0)
    return jnp.transpose(out, (0, 3, 1, 2))


# ----------------------------------- main ----------------------------------- #

if __name__ == "__main__":
    N, C, H, W = 2, 4, 16, 16           # NCHW; in_planes == planes == 4, stride == 1
    eps = 1e-5                          # PyTorch BatchNorm2d default eps

    key = jax.random.PRNGKey(0)
    keys = jax.random.split(key, 1 + 4 * 4)
    x = jax.random.normal(keys[0], (N, C, H, W), jnp.float32)

    params = {}
    for i in range(1, 5):
        kw, kg, kb, km = keys[1 + 4 * (i - 1): 1 + 4 * i]
        params[f'w{i}'] = 0.15 * jax.random.normal(kw, (3, 3, C, C), jnp.float32)
        gamma = 1.0 + 0.1 * jax.random.normal(kg, (C,), jnp.float32)
        beta = 0.1 * jax.random.normal(kb, (C,), jnp.float32)
        mean = 0.1 * jax.random.normal(km, (C,), jnp.float32)
        var = jnp.linspace(0.8, 1.2, C, dtype=jnp.float32)
        scale = gamma / jnp.sqrt(var + eps)          # fused eval-mode BN
        bias = beta - mean * scale
        params[f'scale{i}'] = scale
        params[f'bias{i}'] = bias

    out = jax.block_until_ready(midblock_forward(x, params))
    ref = jax.block_until_ready(ref_forward(x, params))
    np.testing.assert_allclose(np.asarray(out), np.asarray(ref),
                               rtol=1e-2, atol=1e-2)
    print("KERNEL_OK")
</pallas_src>

<mosaic_0001>
module attributes {stable_mosaic.version = 11 : i64} {
  func.func @_midblock_kernel(%arg0: i32, %arg1: memref<1x16x64xf32, #tpu.memory_space<vmem>>, %arg2: memref<4x64xf32, #tpu.memory_space<vmem>>, %arg3: memref<4x64xf32, #tpu.memory_space<vmem>>, %arg4: memref<4x3x64x64xbf16, #tpu.memory_space<vmem>>, %arg5: memref<1x16x64xf32, #tpu.memory_space<vmem>>, %arg6: memref<18x64xf32, #tpu.memory_space<vmem>>) attributes {dimension_semantics = [#tpu.dimension_semantics<parallel>], iteration_bounds = array<i64: 2>, scalar_prefetch = 0 : i64, scratch_operands = 1 : i64, tpu.core_type = #tpu.core_type<tc>, window_params = [{transform_indices = @transform_0, window_bounds = array<i64: 1, 16, 64>}, {pipeline_mode = #tpu.pipeline_mode<synchronous>, transform_indices = @transform_1, window_bounds = array<i64: 4, 64>}, {pipeline_mode = #tpu.pipeline_mode<synchronous>, transform_indices = @transform_2, window_bounds = array<i64: 4, 64>}, {pipeline_mode = #tpu.pipeline_mode<synchronous>, transform_indices = @transform_3, window_bounds = array<i64: 4, 3, 64, 64>}, {transform_indices = @transform_4, window_bounds = array<i64: 1, 16, 64>}]} {
    %cst = arith.constant 0.000000e+00 : f32
    %0 = vector.broadcast %cst : f32 to vector<1x64xf32>
    %c0 = arith.constant 0 : index
    %c0_0 = arith.constant 0 : index
    %1 = vector.load %arg6[%c0, %c0_0] : memref<18x64xf32, #tpu.memory_space<vmem>>, vector<1x64xf32>
    tpu.vector_store %arg6[%c0, %c0_0], %0 {strides = array<i32>} : memref<18x64xf32, #tpu.memory_space<vmem>>, vector<1x64xf32>,
    %c17 = arith.constant 17 : index
    %c0_1 = arith.constant 0 : index
    %2 = vector.load %arg6[%c17, %c0_1] : memref<18x64xf32, #tpu.memory_space<vmem>>, vector<1x64xf32>
    tpu.vector_store %arg6[%c17, %c0_1], %0 {strides = array<i32>} : memref<18x64xf32, #tpu.memory_space<vmem>>, vector<1x64xf32>,
    %c0_2 = arith.constant 0 : index
    %c0_3 = arith.constant 0 : index
    %c0_4 = arith.constant 0 : index
    %3 = vector.load %arg1[%c0_2, %c0_3, %c0_4] : memref<1x16x64xf32, #tpu.memory_space<vmem>>, vector<1x16x64xf32>
    %4 = vector.shape_cast %3 : vector<1x16x64xf32> to vector<16x64xf32>
    %c0_5 = arith.constant 0 : index
    %c0_6 = arith.constant 0 : index
    %5 = vector.load %arg2[%c0_5, %c0_6] : memref<4x64xf32, #tpu.memory_space<vmem>>, vector<1x64xf32>
    %6 = vector.broadcast %5 : vector<1x64xf32> to vector<16x64xf32>
    %7 = arith.mulf %4, %6 : vector<16x64xf32>
    %c0_7 = arith.constant 0 : index
    %c0_8 = arith.constant 0 : index
    %8 = vector.load %arg3[%c0_7, %c0_8] : memref<4x64xf32, #tpu.memory_space<vmem>>, vector<1x64xf32>
    %9 = vector.broadcast %8 : vector<1x64xf32> to vector<16x64xf32>
    %10 = arith.addf %7, %9 : vector<16x64xf32>
    %cst_9 = arith.constant 0.000000e+00 : f32
    %11 = vector.broadcast %cst_9 : f32 to vector<16x64xf32>
    %12 = arith.maximumf %10, %11 : vector<16x64xf32>
    %c1 = arith.constant 1 : index
    %c0_10 = arith.constant 0 : index
    %13 = vector.load %arg6[%c1, %c0_10] : memref<18x64xf32, #tpu.memory_space<vmem>>, vector<16x64xf32>
    tpu.vector_store %arg6[%c1, %c0_10], %12 {strides = array<i32>} : memref<18x64xf32, #tpu.memory_space<vmem>>, vector<16x64xf32>,
    %cst_11 = arith.constant 0.000000e+00 : f32
    %14 = vector.broadcast %cst_11 : f32 to vector<16x64xf32>
    %c0_12 = arith.constant 0 : index
    %c0_13 = arith.constant 0 : index
    %15 = vector.load %arg6[%c0_12, %c0_13] : memref<18x64xf32, #tpu.memory_space<vmem>>, vector<16x64xf32>
    %16 = arith.truncf %15 : vector<16x64xf32> to vector<16x64xbf16>
    %c0_14 = arith.constant 0 : index
    %c0_15 = arith.constant 0 : index
    %c0_16 = arith.constant 0 : index
    %c0_17 = arith.constant 0 : index
    %17 = vector.load %arg4[%c0_14, %c0_15, %c0_16, %c0_17] : memref<4x3x64x64xbf16, #tpu.memory_space<vmem>>, vector<1x1x64x64xbf16>
    %18 = vector.shape_cast %17 : vector<1x1x64x64xbf16> to vector<64x64xbf16>
    %cst_18 = arith.constant dense<0.000000e+00> : vector<16x64xf32>
    %19 = tpu.matmul %16, %18, %cst_18 {dimension_numbers = #tpu.dot_dimension_numbers<[1], [0], [0], [1], [0, 0, 1, 1], [], []>} : vector<16x64xbf16>, vector<64x64xbf16>, vector<16x64xf32> -> vector<16x64xf32>
    %20 = arith.addf %14, %19 : vector<16x64xf32>
    %c1_19 = arith.constant 1 : index
    %c0_20 = arith.constant 0 : index
    %21 = vector.load %arg6[%c1_19, %c0_20] : memref<18x64xf32, #tpu.memory_space<vmem>>, vector<16x64xf32>
    %22 = arith.truncf %21 : vector<16x64xf32> to vector<16x64xbf16>
    %c0_21 = arith.constant 0 : index
    %c1_22 = arith.constant 1 : index
    %c0_23 = arith.constant 0 : index
    %c0_24 = arith.constant 0 : index
    %23 = vector.load %arg4[%c0_21, %c1_22, %c0_23, %c0_24] : memref<4x3x64x64xbf16, #tpu.memory_space<vmem>>, vector<1x1x64x64xbf16>
    %24 = vector.shape_cast %23 : vector<1x1x64x64xbf16> to vector<64x64xbf16>
    %cst_25 = arith.constant dense<0.000000e+00> : vector<16x64xf32>
    %25 = tpu.matmul %22, %24, %cst_25 {dimension_numbers = #tpu.dot_dimension_numbers<[1], [0], [0], [1], [0, 0, 1, 1], [], []>} : vector<16x64xbf16>, vector<64x64xbf16>, vector<16x64xf32> -> vector<16x64xf32>
    %26 = arith.addf %20, %25 : vector<16x64xf32>
    %c2 = arith.constant 2 : index
    %c0_26 = arith.constant 0 : index
    %27 = vector.load %arg6[%c2, %c0_26] : memref<18x64xf32, #tpu.memory_space<vmem>>, vector<16x64xf32>
    %28 = arith.truncf %27 : vector<16x64xf32> to vector<16x64xbf16>
    %c0_27 = arith.constant 0 : index
    %c2_28 = arith.constant 2 : index
    %c0_29 = arith.constant 0 : index
    %c0_30 = arith.constant 0 : index
    %29 = vector.load %arg4[%c0_27, %c2_28, %c0_29, %c0_30] : memref<4x3x64x64xbf16, #tpu.memory_space<vmem>>, vector<1x1x64x64xbf16>
    %30 = vector.shape_cast %29 : vector<1x1x64x64xbf16> to vector<64x64xbf16>
    %cst_31 = arith.constant dense<0.000000e+00> : vector<16x64xf32>
    %31 = tpu.matmul %28, %30, %cst_31 {dimension_numbers = #tpu.dot_dimension_numbers<[1], [0], [0], [1], [0, 0, 1, 1], [], []>} : vector<16x64xbf16>, vector<64x64xbf16>, vector<16x64xf32> -> vector<16x64xf32>
    %32 = arith.addf %26, %31 : vector<16x64xf32>
    %c1_32 = arith.constant 1 : index
    %c0_33 = arith.constant 0 : index
    %33 = vector.load %arg2[%c1_32, %c0_33] : memref<4x64xf32, #tpu.memory_space<vmem>>, vector<1x64xf32>
    %34 = vector.broadcast %33 : vector<1x64xf32> to vector<16x64xf32>
    %35 = arith.mulf %32, %34 : vector<16x64xf32>
    %c1_34 = arith.constant 1 : index
    %c0_35 = arith.constant 0 : index
    %36 = vector.load %arg3[%c1_34, %c0_35] : memref<4x64xf32, #tpu.memory_space<vmem>>, vector<1x64xf32>
    %37 = vector.broadcast %36 : vector<1x64xf32> to vector<16x64xf32>
    %38 = arith.addf %35, %37 : vector<16x64xf32>
    %cst_36 = arith.constant 0.000000e+00 : f32
    %39 = vector.broadcast %cst_36 : f32 to vector<16x64xf32>
    %40 = arith.maximumf %38, %39 : vector<16x64xf32>
    %c1_37 = arith.constant 1 : index
    %c0_38 = arith.constant 0 : index
    %41 = vector.load %arg6[%c1_37, %c0_38] : memref<18x64xf32, #tpu.memory_space<vmem>>, vector<16x64xf32>
    tpu.vector_store %arg6[%c1_37, %c0_38], %40 {strides = array<i32>} : memref<18x64xf32, #tpu.memory_space<vmem>>, vector<16x64xf32>,
    %cst_39 = arith.constant 0.000000e+00 : f32
    %42 = vector.broadcast %cst_39 : f32 to vector<16x64xf32>
    %c0_40 = arith.constant 0 : index
    %c0_41 = arith.constant 0 : index
    %43 = vector.load %arg6[%c0_40, %c0_41] : memref<18x64xf32, #tpu.memory_space<vmem>>, vector<16x64xf32>
    %44 = arith.truncf %43 : vector<16x64xf32> to vector<16x64xbf16>
    %c1_42 = arith.constant 1 : index
    %c0_43 = arith.constant 0 : index
    %c0_44 = arith.constant 0 : index
    %c0_45 = arith.constant 0 : index
    %45 = vector.load %arg4[%c1_42, %c0_43, %c0_44, %c0_45] : memref<4x3x64x64xbf16, #tpu.memory_space<vmem>>, vector<1x1x64x64xbf16>
    %46 = vector.shape_cast %45 : vector<1x1x64x64xbf16> to vector<64x64xbf16>
    %cst_46 = arith.constant dense<0.000000e+00> : vector<16x64xf32>
    %47 = tpu.matmul %44, %46, %cst_46 {dimension_numbers = #tpu.dot_dimension_numbers<[1], [0], [0], [1], [0, 0, 1, 1], [], []>} : vector<16x64xbf16>, vector<64x64xbf16>, vector<16x64xf32> -> vector<16x64xf32>
    %48 = arith.addf %42, %47 : vector<16x64xf32>
    %c1_47 = arith.constant 1 : index
    %c0_48 = arith.constant 0 : index
    %49 = vector.load %arg6[%c1_47, %c0_48] : memref<18x64xf32, #tpu.memory_space<vmem>>, vector<16x64xf32>
    %50 = arith.truncf %49 : vector<16x64xf32> to vector<16x64xbf16>
    %c1_49 = arith.constant 1 : index
    %c1_50 = arith.constant 1 : index
    %c0_51 = arith.constant 0 : index
    %c0_52 = arith.constant 0 : index
    %51 = vector.load %arg4[%c1_49, %c1_50, %c0_51, %c0_52] : memref<4x3x64x64xbf16, #tpu.memory_space<vmem>>, vector<1x1x64x64xbf16>
    %52 = vector.shape_cast %51 : vector<1x1x64x64xbf16> to vector<64x64xbf16>
    %cst_53 = arith.constant dense<0.000000e+00> : vector<16x64xf32>
    %53 = tpu.matmul %50, %52, %cst_53 {dimension_numbers = #tpu.dot_dimension_numbers<[1], [0], [0], [1], [0, 0, 1, 1], [], []>} : vector<16x64xbf16>, vector<64x64xbf16>, vector<16x64xf32> -> vector<16x64xf32>
    %54 = arith.addf %48, %53 : vector<16x64xf32>
    %c2_54 = arith.constant 2 : index
    %c0_55 = arith.constant 0 : index
    %55 = vector.load %arg6[%c2_54, %c0_55] : memref<18x64xf32, #tpu.memory_space<vmem>>, vector<16x64xf32>
    %56 = arith.truncf %55 : vector<16x64xf32> to vector<16x64xbf16>
    %c1_56 = arith.constant 1 : index
    %c2_57 = arith.constant 2 : index
    %c0_58 = arith.constant 0 : index
    %c0_59 = arith.constant 0 : index
    %57 = vector.load %arg4[%c1_56, %c2_57, %c0_58, %c0_59] : memref<4x3x64x64xbf16, #tpu.memory_space<vmem>>, vector<1x1x64x64xbf16>
    %58 = vector.shape_cast %57 : vector<1x1x64x64xbf16> to vector<64x64xbf16>
    %cst_60 = arith.constant dense<0.000000e+00> : vector<16x64xf32>
    %59 = tpu.matmul %56, %58, %cst_60 {dimension_numbers = #tpu.dot_dimension_numbers<[1], [0], [0], [1], [0, 0, 1, 1], [], []>} : vector<16x64xbf16>, vector<64x64xbf16>, vector<16x64xf32> -> vector<16x64xf32>
    %60 = arith.addf %54, %59 : vector<16x64xf32>
    %cst_61 = arith.constant 5.000000e-01 : f32
    %61 = vector.broadcast %cst_61 : f32 to vector<16x64xf32>
    %62 = arith.mulf %61, %60 : vector<16x64xf32>
    %63 = arith.addf %62, %4 : vector<16x64xf32>
    %c2_62 = arith.constant 2 : index
    %c0_63 = arith.constant 0 : index
    %64 = vector.load %arg2[%c2_62, %c0_63] : memref<4x64xf32, #tpu.memory_space<vmem>>, vector<1x64xf32>
    %65 = vector.broadcast %64 : vector<1x64xf32> to vector<16x64xf32>
    %66 = arith.mulf %63, %65 : vector<16x64xf32>
    %c2_64 = arith.constant 2 : index
    %c0_65 = arith.constant 0 : index
    %67 = vector.load %arg3[%c2_64, %c0_65] : memref<4x64xf32, #tpu.memory_space<vmem>>, vector<1x64xf32>
    %68 = vector.broadcast %67 : vector<1x64xf32> to vector<16x64xf32>
    %69 = arith.addf %66, %68 : vector<16x64xf32>
    %cst_66 = arith.constant 0.000000e+00 : f32
    %70 = vector.broadcast %cst_66 : f32 to vector<16x64xf32>
    %71 = arith.maximumf %69, %70 : vector<16x64xf32>
    %c1_67 = arith.constant 1 : index
    %c0_68 = arith.constant 0 : index
    %72 = vector.load %arg6[%c1_67, %c0_68] : memref<18x64xf32, #tpu.memory_space<vmem>>, vector<16x64xf32>
    tpu.vector_store %arg6[%c1_67, %c0_68], %71 {strides = array<i32>} : memref<18x64xf32, #tpu.memory_space<vmem>>, vector<16x64xf32>,
    %cst_69 = arith.constant 0.000000e+00 : f32
    %73 = vector.broadcast %cst_69 : f32 to vector<16x64xf32>
    %c0_70 = arith.constant 0 : index
    %c0_71 = arith.constant 0 : index
    %74 = vector.load %arg6[%c0_70, %c0_71] : memref<18x64xf32, #tpu.memory_space<vmem>>, vector<16x64xf32>
    %75 = arith.truncf %74 : vector<16x64xf32> to vector<16x64xbf16>
    %c2_72 = arith.constant 2 : index
    %c0_73 = arith.constant 0 : index
    %c0_74 = arith.constant 0 : index
    %c0_75 = arith.constant 0 : index
    %76 = vector.load %arg4[%c2_72, %c0_73, %c0_74, %c0_75] : memref<4x3x64x64xbf16, #tpu.memory_space<vmem>>, vector<1x1x64x64xbf16>
    %77 = vector.shape_cast %76 : vector<1x1x64x64xbf16> to vector<64x64xbf16>
    %cst_76 = arith.constant dense<0.000000e+00> : vector<16x64xf32>
    %78 = tpu.matmul %75, %77, %cst_76 {dimension_numbers = #tpu.dot_dimension_numbers<[1], [0], [0], [1], [0, 0, 1, 1], [], []>} : vector<16x64xbf16>, vector<64x64xbf16>, vector<16x64xf32> -> vector<16x64xf32>
    %79 = arith.addf %73, %78 : vector<16x64xf32>
    %c1_77 = arith.constant 1 : index
    %c0_78 = arith.constant 0 : index
    %80 = vector.load %arg6[%c1_77, %c0_78] : memref<18x64xf32, #tpu.memory_space<vmem>>, vector<16x64xf32>
    %81 = arith.truncf %80 : vector<16x64xf32> to vector<16x64xbf16>
    %c2_79 = arith.constant 2 : index
    %c1_80 = arith.constant 1 : index
    %c0_81 = arith.constant 0 : index
    %c0_82 = arith.constant 0 : index
    %82 = vector.load %arg4[%c2_79, %c1_80, %c0_81, %c0_82] : memref<4x3x64x64xbf16, #tpu.memory_space<vmem>>, vector<1x1x64x64xbf16>
    %83 = vector.shape_cast %82 : vector<1x1x64x64xbf16> to vector<64x64xbf16>
    %cst_83 = arith.constant dense<0.000000e+00> : vector<16x64xf32>
    %84 = tpu.matmul %81, %83, %cst_83 {dimension_numbers = #tpu.dot_dimension_numbers<[1], [0], [0], [1], [0, 0, 1, 1], [], []>} : vector<16x64xbf16>, vector<64x64xbf16>, vector<16x64xf32> -> vector<16x64xf32>
    %85 = arith.addf %79, %84 : vector<16x64xf32>
    %c2_84 = arith.constant 2 : index
    %c0_85 = arith.constant 0 : index
    %86 = vector.load %arg6[%c2_84, %c0_85] : memref<18x64xf32, #tpu.memory_space<vmem>>, vector<16x64xf32>
    %87 = arith.truncf %86 : vector<16x64xf32> to vector<16x64xbf16>
    %c2_86 = arith.constant 2 : index
    %c2_87 = arith.constant 2 : index
    %c0_88 = arith.constant 0 : index
    %c0_89 = arith.constant 0 : index
    %88 = vector.load %arg4[%c2_86, %c2_87, %c0_88, %c0_89] : memref<4x3x64x64xbf16, #tpu.memory_space<vmem>>, vector<1x1x64x64xbf16>
    %89 = vector.shape_cast %88 : vector<1x1x64x64xbf16> to vector<64x64xbf16>
    %cst_90 = arith.constant dense<0.000000e+00> : vector<16x64xf32>
    %90 = tpu.matmul %87, %89, %cst_90 {dimension_numbers = #tpu.dot_dimension_numbers<[1], [0], [0], [1], [0, 0, 1, 1], [], []>} : vector<16x64xbf16>, vector<64x64xbf16>, vector<16x64xf32> -> vector<16x64xf32>
    %91 = arith.addf %85, %90 : vector<16x64xf32>
    %c3 = arith.constant 3 : index
    %c0_91 = arith.constant 0 : index
    %92 = vector.load %arg2[%c3, %c0_91] : memref<4x64xf32, #tpu.memory_space<vmem>>, vector<1x64xf32>
    %93 = vector.broadcast %92 : vector<1x64xf32> to vector<16x64xf32>
    %94 = arith.mulf %91, %93 : vector<16x64xf32>
    %c3_92 = arith.constant 3 : index
    %c0_93 = arith.constant 0 : index
    %95 = vector.load %arg3[%c3_92, %c0_93] : memref<4x64xf32, #tpu.memory_space<vmem>>, vector<1x64xf32>
    %96 = vector.broadcast %95 : vector<1x64xf32> to vector<16x64xf32>
    %97 = arith.addf %94, %96 : vector<16x64xf32>
    %cst_94 = arith.constant 0.000000e+00 : f32
    %98 = vector.broadcast %cst_94 : f32 to vector<16x64xf32>
    %99 = arith.maximumf %97, %98 : vector<16x64xf32>
    %c1_95 = arith.constant 1 : index
    %c0_96 = arith.constant 0 : index
    %100 = vector.load %arg6[%c1_95, %c0_96] : memref<18x64xf32, #tpu.memory_space<vmem>>, vector<16x64xf32>
    tpu.vector_store %arg6[%c1_95, %c0_96], %99 {strides = array<i32>} : memref<18x64xf32, #tpu.memory_space<vmem>>, vector<16x64xf32>,
    %cst_97 = arith.constant 0.000000e+00 : f32
    %101 = vector.broadcast %cst_97 : f32 to vector<16x64xf32>
    %c0_98 = arith.constant 0 : index
    %c0_99 = arith.constant 0 : index
    %102 = vector.load %arg6[%c0_98, %c0_99] : memref<18x64xf32, #tpu.memory_space<vmem>>, vector<16x64xf32>
    %103 = arith.truncf %102 : vector<16x64xf32> to vector<16x64xbf16>
    %c3_100 = arith.constant 3 : index
    %c0_101 = arith.constant 0 : index
    %c0_102 = arith.constant 0 : index
    %c0_103 = arith.constant 0 : index
    %104 = vector.load %arg4[%c3_100, %c0_101, %c0_102, %c0_103] : memref<4x3x64x64xbf16, #tpu.memory_space<vmem>>, vector<1x1x64x64xbf16>
    %105 = vector.shape_cast %104 : vector<1x1x64x64xbf16> to vector<64x64xbf16>
    %cst_104 = arith.constant dense<0.000000e+00> : vector<16x64xf32>
    %106 = tpu.matmul %103, %105, %cst_104 {dimension_numbers = #tpu.dot_dimension_numbers<[1], [0], [0], [1], [0, 0, 1, 1], [], []>} : vector<16x64xbf16>, vector<64x64xbf16>, vector<16x64xf32> -> vector<16x64xf32>
    %107 = arith.addf %101, %106 : vector<16x64xf32>
    %c1_105 = arith.constant 1 : index
    %c0_106 = arith.constant 0 : index
    %108 = vector.load %arg6[%c1_105, %c0_106] : memref<18x64xf32, #tpu.memory_space<vmem>>, vector<16x64xf32>
    %109 = arith.truncf %108 : vector<16x64xf32> to vector<16x64xbf16>
    %c3_107 = arith.constant 3 : index
    %c1_108 = arith.constant 1 : index
    %c0_109 = arith.constant 0 : index
    %c0_110 = arith.constant 0 : index
    %110 = vector.load %arg4[%c3_107, %c1_108, %c0_109, %c0_110] : memref<4x3x64x64xbf16, #tpu.memory_space<vmem>>, vector<1x1x64x64xbf16>
    %111 = vector.shape_cast %110 : vector<1x1x64x64xbf16> to vector<64x64xbf16>
    %cst_111 = arith.constant dense<0.000000e+00> : vector<16x64xf32>
    %112 = tpu.matmul %109, %111, %cst_111 {dimension_numbers = #tpu.dot_dimension_numbers<[1], [0], [0], [1], [0, 0, 1, 1], [], []>} : vector<16x64xbf16>, vector<64x64xbf16>, vector<16x64xf32> -> vector<16x64xf32>
    %113 = arith.addf %107, %112 : vector<16x64xf32>
    %c2_112 = arith.constant 2 : index
    %c0_113 = arith.constant 0 : index
    %114 = vector.load %arg6[%c2_112, %c0_113] : memref<18x64xf32, #tpu.memory_space<vmem>>, vector<16x64xf32>
    %115 = arith.truncf %114 : vector<16x64xf32> to vector<16x64xbf16>
    %c3_114 = arith.constant 3 : index
    %c2_115 = arith.constant 2 : index
    %c0_116 = arith.constant 0 : index
    %c0_117 = arith.constant 0 : index
    %116 = vector.load %arg4[%c3_114, %c2_115, %c0_116, %c0_117] : memref<4x3x64x64xbf16, #tpu.memory_space<vmem>>, vector<1x1x64x64xbf16>
    %117 = vector.shape_cast %116 : vector<1x1x64x64xbf16> to vector<64x64xbf16>
    %cst_118 = arith.constant dense<0.000000e+00> : vector<16x64xf32>
    %118 = tpu.matmul %115, %117, %cst_118 {dimension_numbers = #tpu.dot_dimension_numbers<[1], [0], [0], [1], [0, 0, 1, 1], [], []>} : vector<16x64xbf16>, vector<64x64xbf16>, vector<16x64xf32> -> vector<16x64xf32>
    %119 = arith.addf %113, %118 : vector<16x64xf32>
    %120 = arith.addf %119, %4 : vector<16x64xf32>
    %cst_119 = arith.constant 0.000000e+00 : f32
    %121 = vector.broadcast %cst_119 : f32 to vector<16x64xf32>
    %122 = arith.maximumf %120, %121 : vector<16x64xf32>
    %c0_120 = arith.constant 0 : index
    %c0_121 = arith.constant 0 : index
    %c0_122 = arith.constant 0 : index
    %123 = vector.load %arg5[%c0_120, %c0_121, %c0_122] : memref<1x16x64xf32, #tpu.memory_space<vmem>>, vector<1x16x64xf32>
    %124 = vector.shape_cast %123 : vector<1x16x64xf32> to vector<16x64xf32>
    %125 = vector.shape_cast %122 : vector<16x64xf32> to vector<1x16x64xf32>
    tpu.vector_store %arg5[%c0_120, %c0_121, %c0_122], %125 {strides = array<i32>} : memref<1x16x64xf32, #tpu.memory_space<vmem>>, vector<1x16x64xf32>,
    return
  }
  func.func @transform_0(%arg0: i32) -> (i32, i32, i32) {
    %c0_i32 = arith.constant 0 : i32
    %c0_i32_0 = arith.constant 0 : i32
    %c0_i32_1 = arith.constant 0 : i32
    return %arg0, %c0_i32, %c0_i32_0 : i32, i32, i32
  }
  func.func @transform_1(%arg0: i32) -> (i32, i32) {
    %c0_i32 = arith.constant 0 : i32
    %c0_i32_0 = arith.constant 0 : i32
    %c0_i32_1 = arith.constant 0 : i32
    return %c0_i32, %c0_i32_0 : i32, i32
  }
  func.func @transform_2(%arg0: i32) -> (i32, i32) {
    %c0_i32 = arith.constant 0 : i32
    %c0_i32_0 = arith.constant 0 : i32
    %c0_i32_1 = arith.constant 0 : i32
    return %c0_i32, %c0_i32_0 : i32, i32
  }
  func.func @transform_3(%arg0: i32) -> (i32, i32, i32, i32) {
    %c0_i32 = arith.constant 0 : i32
    %c0_i32_0 = arith.constant 0 : i32
    %c0_i32_1 = arith.constant 0 : i32
    %c0_i32_2 = arith.constant 0 : i32
    %c0_i32_3 = arith.constant 0 : i32
    return %c0_i32, %c0_i32_0, %c0_i32_1, %c0_i32_2 : i32, i32, i32, i32
  }
  func.func @transform_4(%arg0: i32) -> (i32, i32, i32) {
    %c0_i32 = arith.constant 0 : i32
    %c0_i32_0 = arith.constant 0 : i32
    %c0_i32_1 = arith.constant 0 : i32
    return %arg0, %c0_i32, %c0_i32_0 : i32, i32, i32
  }
}

</mosaic_0001>

<bundles_post_ra>
// kernel: tile.43
= control target key start
LH: loop header
LB: loop body
LE: loop exit
PB: predicated region body
PF: predicated region fallthrough
CT: control target
= control target key end

     0   :  { %s28_s0 = inlined_call_operand.vmem [shape: f32[4], index: 0, kind: input, shape index: {}]   ;;  %s29_s1 = inlined_call_operand.vmem [shape: f32[16,4], index: 1, kind: output, shape index: {}]  }
   0x1   :  { %v4_v0 = vld [vmem:[%s28_s0] ss:$0 sm:$0xff] }
   0x2   :  { %5 = vst [vmem:[%s29_s1] sm:$0xff] %v4_v0  ;;  %8 = vst [vmem:[%s29_s1 + $0x8] sm:$0xff] %v4_v0 }

// kernel: tile.56
= control target key start
LH: loop header
LB: loop body
LE: loop exit
PB: predicated region body
PF: predicated region fallthrough
CT: control target
= control target key end

     0   :  { %s131_s10 = smov 60   ;;  %s132_s11 = smov 52   ;;  %vm3_vm0 = vcmask 31744   ;;  %vm9_vm1 = vcmask 523744   ;;  %vm15_vm2 = vcmask 490944   ;;  %vm21_vm3 = vcmask 458144   ;;  %s207_s0 = inlined_call_operand.vmem [shape: f32[16,4], index: 0, kind: input, shape index: {}]   ;;  %s208_s1 = inlined_call_operand.vmem [shape: f32[1,64], index: 1, kind: output, shape index: {}]  }
   0x1   :  { %v101_v0 = vld [vmem:[%s207_s0 + $0xf] sm:$0x1]   ;;  %v103_v1 = vld [vmem:[%s207_s0 + $0xd] sm:$0x1]   ;;  %v102_v2 = vld [vmem:[%s207_s0 + $0xe] sm:$0x1]  }
   0x2   :  { %7 = vrot.lane.b32.xlu0 %v101_v0, %s131_s10  ;;  %19 = vrot.lane.b32.xlu1 %v103_v1, %s132_s11  ;;  %v104_v3 = vld [vmem:[%s207_s0 + $0xc] sm:$0x1]   ;;  %s133_s16 = smov 56   ;;  %s134_s17 = smov 48   ;;  %v105_v4 = vld [vmem:[%s207_s0 + $0xb] sm:$0x1]  }
   0x3   :  { %v106_v5 = vld [vmem:[%s207_s0 + $0xa] sm:$0x1]   ;;  %v2_v6 = vld [vmem:[%s207_s0] sm:$0x1]   ;;  %s135_s24 = smov 44   ;;  %s136_s25 = smov 40  }
   0x4   :  { %4 = vst.msk [vmem:[#allocation0] sm:$0x1] %vm3_vm0, %v2_v6   ;;  %v107_v7 = vld [vmem:[%s207_s0 + $0x9] sm:$0x1]   ;;  %v108_v8 = vld [vmem:[%s207_s0 + $0x8] sm:$0x1]  }
   0x5   :  { %s137_s30 = smov 36   ;;  %s138_s2 = smov 32   ;;  %v109_v9 = vld [vmem:[%s207_s0 + $0x7] sm:$0x1]   ;;  %v110_v10 = vld [vmem:[%s207_s0 + $0x6] sm:$0x1]  }
   0x6   :  { %13 = vrot.lane.b32.xlu0 %v102_v2, %s133_s16  ;;  %25 = vrot.lane.b32.xlu1 %v104_v3, %s134_s17  ;;  %s139_s7 = smov 28   ;;  %s140_s8 = smov 24   ;;  %v111_v11 = vld [vmem:[%s207_s0 + $0x5] sm:$0x1]   ;;  %v112_v12 = vld [vmem:[%s207_s0 + $0x4] sm:$0x1]  }
   0x7   :  { %s141_s13 = smov 20   ;;  %s142_s14 = smov 16   ;;  %v113_v13 = vld [vmem:[%s207_s0 + $0x3] sm:$0x1]   ;;  %v114_v14 = vld [vmem:[%s207_s0 + $0x2] sm:$0x1]  }
   0x8   :  { %s143_s19 = smov 12   ;;  %s144_s20 = smov 8   ;;  %v115_v15 = vld [vmem:[%s207_s0 + $0x1] sm:$0x1]   ;;  %vm27_vm4 = vcmask 425344   ;;  %vm33_vm5 = vcmask 392544  }
   0x9   :  { %s145_s0 = smov 4   ;;  %vm39_vm6 = vcmask 359744   ;;  %vm45_vm7 = vcmask 326944   ;;  %vm51_vm8 = vcmask 294144   ;;  %vm57_vm9 = vcmask 261344  }
   0xa   :  { %31 = vrot.lane.b32.xlu0 %v105_v4, %s135_s24  ;;  %37 = vrot.lane.b32.xlu1 %v106_v5, %s136_s25  ;;  %vm63_vm10 = vcmask 228544   ;;  %vm69_vm11 = vcmask 195744   ;;  %vm75_vm12 = vcmask 162944   ;;  %vm81_vm13 = vcmask 130144  }
   0xb   :  { %vm87_vm14 = vcmask 97344   ;;  %vm93_vm15 = vcmask 64544  }
   0xe   :  { %43 = vrot.lane.b32.xlu0 %v107_v7, %s137_s30  ;;  %49 = vrot.lane.b32.xlu1 %v108_v8, %s138_s2 }
  0x12   :  { %55 = vrot.lane.b32.xlu0 %v109_v9, %s139_s7  ;;  %61 = vrot.lane.b32.xlu1 %v110_v10, %s140_s8 }
  0x16   :  { %67 = vrot.lane.b32.xlu0 %v111_v11, %s141_s13  ;;  %73 = vrot.lane.b32.xlu1 %v112_v12, %s142_s14 }
  0x1a   :  { %79 = vrot.lane.b32.xlu0 %v113_v13, %s143_s19  ;;  %85 = vrot.lane.b32.xlu1 %v114_v14, %s144_s20 }
  0x1e   :  { %91 = vrot.lane.b32.xlu0 %v115_v15, %s145_s0 }
  0x74   :  { %v8_v16 = vpop.permute.xlu0 %7   ;;  %v20_v17 = vpop.permute.xlu1 %19  }
  0x75   :  { %10 = vst.msk [vmem:[#allocation0] sm:$0x1] %vm9_vm1, %v8_v16  }
  0x78   :  { %v14_v18 = vpop.permute.xlu0 %13   ;;  %v26_v19 = vpop.permute.xlu1 %25  }
  0x79   :  { %16 = vst.msk [vmem:[#allocation0] sm:$0x1] %vm15_vm2, %v14_v18  }
  0x7a   :  { %22 = vst.msk [vmem:[#allocation0] sm:$0x1] %vm21_vm3, %v20_v17  }
  0x7b   :  { %28 = vst.msk [vmem:[#allocation0] sm:$0x1] %vm27_vm4, %v26_v19  }
  0x7c   :  { %v32_v20 = vpop.permute.xlu0 %31   ;;  %v38_v21 = vpop.permute.xlu1 %37  }
  0x7d   :  { %34 = vst.msk [vmem:[#allocation0] sm:$0x1] %vm33_vm5, %v32_v20  }
  0x7e   :  { %40 = vst.msk [vmem:[#allocation0] sm:$0x1] %vm39_vm6, %v38_v21  }
  0x80   :  { %v44_v22 = vpop.permute.xlu0 %43   ;;  %v50_v23 = vpop.permute.xlu1 %49  }
  0x81   :  { %46 = vst.msk [vmem:[#allocation0] sm:$0x1] %vm45_vm7, %v44_v22  }
  0x82   :  { %52 = vst.msk [vmem:[#allocation0] sm:$0x1] %vm51_vm8, %v50_v23  }
  0x84   :  { %v56_v24 = vpop.permute.xlu0 %55   ;;  %v62_v25 = vpop.permute.xlu1 %61  }
  0x85   :  { %58 = vst.msk [vmem:[#allocation0] sm:$0x1] %vm57_vm9, %v56_v24  }
  0x86   :  { %64 = vst.msk [vmem:[#allocation0] sm:$0x1] %vm63_vm10, %v62_v25  }
  0x88   :  { %v68_v26 = vpop.permute.xlu0 %67   ;;  %v74_v27 = vpop.permute.xlu1 %73  }
  0x89   :  { %70 = vst.msk [vmem:[#allocation0] sm:$0x1] %vm69_vm11, %v68_v26  }
  0x8a   :  { %76 = vst.msk [vmem:[#allocation0] sm:$0x1] %vm75_vm12, %v74_v27  }
  0x8c   :  { %v80_v28 = vpop.permute.xlu0 %79   ;;  %v86_v29 = vpop.permute.xlu1 %85  }
  0x8d   :  { %82 = vst.msk [vmem:[#allocation0] sm:$0x1] %vm81_vm13, %v80_v28  }
  0x8e   :  { %88 = vst.msk [vmem:[#allocation0] sm:$0x1] %vm87_vm14, %v86_v29  }
  0x90   :  { %v92_v30 = vpop.permute.xlu0 %91  }
  0x91   :  { %94 = vst.msk [vmem:[#allocation0] sm:$0x1] %vm93_vm15, %v92_v30  }
  0x98   :  { %v98_v31 = vld [vmem:[#allocation0] sm:$0x1] }
  0x99   :  { %100 = vst [vmem:[%s208_s1] sm:$0x1] %v98_v31 }

// kernel: midblock_forward.1
= control target key start
LH: loop header
LB: loop body
LE: loop exit
PB: predicated region body
PF: predicated region fallthrough
CT: control target
= control target key end

     0   :  { %s1799_s15 = smov 0   ;;  %s2097_s0 = inlined_call_operand.vmem [shape: f32[2,16,64], index: 0, kind: input, shape index: {}]   ;;  %s2098_s1 = inlined_call_operand.vmem [shape: f32[4,64], index: 1, kind: input, shape index: {}]   ;;  %s2099_s2 = inlined_call_operand.vmem [shape: f32[4,64], index: 2, kind: input, shape index: {}]   ;;  %s2100_s3 = inlined_call_operand.vmem [shape: bf16[4,3,64,64], index: 3, kind: input, shape index: {}]   ;;  %s2101_s4 = inlined_call_operand.vmem [shape: f32[2,16,64], index: 4, kind: output, shape index: {}]  }
   0x1 LB: > { %s1309_s16 = sadd.s32 4294967295, %s1770_s15   ;;  %p1313_p0 = scmp.ge.s32.totalorder %s1770_s15, 1  ;;  %s1770_s15 = sphi %s1799_s15, %s14_s15  }
   0x2   : > { %p162_p1 = scmp.lt.s32.totalorder %s1770_s15, 3 }
   0x4   : > { %p163_p2 = pnand %p1313_p0, %p162_p1 }
   0x5   : > { %v1716_v0 = vld [vmem:[%s2100_s3 + $0x20] sm:$0xff] (!%p163_p2)   ;;  %v1772_v1 = vmov (!%p163_p2), 0.0   ;;  %v1717_v2 = vld [vmem:[%s2100_s3 + $0x28] sm:$0xff] (!%p163_p2)   ;;  %vm1773_vm0 = vmmov (!%p163_p2), 0   ;;  %p188_p3 = scmp.lt.s32.totalorder (!%p163_p2), %s1309_s16, 1  ;;  %v1718_v4 = vld [vmem:[%s2100_s3 + $0x30] sm:$0xff] (!%p163_p2)  }
   0x6   : > { %166 = sbr.rel (%p163_p2) target bundleno = 1076 (0x434), region = 36  ;;  %1538 = vmatprep.subr.bf16.mxu0 (!%p163_p2), %v1772_v1  ;;  %1574 = vmatprep.subr.bf16.mxu1 (!%p163_p2), %v1772_v1  ;;  %v1318_v3 = vld [vmem:[%s2098_s1] ss:$0 sm:$0xff] (!%p163_p2)  ;;  %vm199_vm1 = vcmask (!%p163_p2), 516096   ;;  %v1719_v10 = vld [vmem:[%s2100_s3 + $0x38] sm:$0xff] (!%p163_p2)   ;;  %vm220_vm2 = vcmask (!%p163_p2), 523264  }
   0x7   : > { %1539 = vmatpush3.bf16.msra.mxu0 (!%p163_p2), %v1716_v0  ;;  %1546 = vmatprep.mubr.msk.bf16.mxu0 (!%p163_p2), %vm1773_vm0, %v1772_v1  ;;  %v1319_v5 = vld [vmem:[%s2099_s2] ss:$0 sm:$0xff] (!%p163_p2)  ;;  %200 = vst.msk [vmem:[#allocation2] sm:$0x1] (!%p163_p2), %vm199_vm1, %v1772_v1  ;;  %201 = vst.msk [vmem:[#allocation2 + $0x11] sm:$0x1] (!%p163_p2), %vm199_vm1, %v1772_v1 }
   0x8   : > { %1540 = vmatprep.subr.bf16.mxu0 (!%p163_p2), %v1772_v1  ;;  %1582 = vmatprep.mubr.msk.bf16.mxu1 (!%p163_p2), %vm1773_vm0, %v1772_v1  ;;  %v1720_v17 = vld [vmem:[%s2100_s3] sm:$0xff] (!%p163_p2)   ;;  %v1721_v19 = vld [vmem:[%s2100_s3 + $0x8] sm:$0xff] (!%p163_p2)   ;;  %v1722_v20 = vld [vmem:[%s2100_s3 + $0x10] sm:$0xff] (!%p163_p2)  }
   0x9   : > { %v1723_v21 = vld [vmem:[%s2100_s3 + $0x18] sm:$0xff] (!%p163_p2)   ;;  %v1724_v24 = vld [vmem:[%s2100_s3 + $0x40] sm:$0xff] (!%p163_p2)   ;;  %v1725_v26 = vld [vmem:[%s2100_s3 + $0x48] sm:$0xff] (!%p163_p2)  }
   0xa   : > { %v1726_v27 = vld [vmem:[%s2100_s3 + $0x50] sm:$0xff] (!%p163_p2)   ;;  %v1727_v28 = vld [vmem:[%s2100_s3 + $0x58] sm:$0xff] (!%p163_p2)   ;;  %v1728_v32 = vld [vmem:[%s2100_s3 + $0x80] sm:$0xff] (!%p163_p2)  }
   0xb   : > { %1541 = vmatpush3.bf16.msra.mxu0 (!%p163_p2), %v1717_v2  ;;  %1575 = vmatpush3.bf16.msra.mxu1 (!%p163_p2), %v1728_v32  ;;  %v1729_v33 = vld [vmem:[%s2100_s3 + $0x88] sm:$0xff] (!%p163_p2)   ;;  %v1730_v34 = vld [vmem:[%s2100_s3 + $0x90] sm:$0xff] (!%p163_p2)   ;;  %v1731_v35 = vld [vmem:[%s2100_s3 + $0x98] sm:$0xff] (!%p163_p2)  }
   0xc   : > { %1542 = vmatprep.subr.bf16.mxu0 (!%p163_p2), %v1772_v1  ;;  %1576 = vmatprep.subr.bf16.mxu1 (!%p163_p2), %v1772_v1  ;;  %v1351_v36 = vld [vmem:[%s2098_s1 + $0x1] ss:$0 sm:$0xff] (!%p163_p2)  ;;  %v1733_v52 = vld [vmem:[%s2100_s3 + $0x68] sm:$0xff] (!%p163_p2)   ;;  %v1734_v53 = vld [vmem:[%s2100_s3 + $0x70] sm:$0xff] (!%p163_p2)  }
   0xd   : > { %s2103_s16 = smov (!%p188_p3, %s1309_s16), 1  ;;  %v1352_v38 = vld [vmem:[%s2099_s2 + $0x1] ss:$0 sm:$0xff]  ;;  %v1735_v54 = vld [vmem:[%s2100_s3 + $0x78] sm:$0xff]   ;;  %v1737_v59 = vld [vmem:[%s2100_s3 + $0xa8] sm:$0xff]  }
   0xe   : > { %s1476_s25 = sshll.u32 %s2103_s16, 4  ;;  %v1732_v50 = vld [vmem:[%s2100_s3 + $0x60] sm:$0xff]   ;;  %v1738_v60 = vld [vmem:[%s2100_s3 + $0xb0] sm:$0xff]   ;;  %v1739_v61 = vld [vmem:[%s2100_s3 + $0xb8] sm:$0xff]  }
   0xf   : > { %s192_s30 = scalar_lea.vmem %s2097_s0, %s1476_s25  ;;  %1543 = vmatpush3.bf16.msra.mxu0 %v1718_v4  ;;  %1577 = vmatpush3.bf16.msra.mxu1 %v1729_v33  ;;  %v1736_v57 = vld [vmem:[%s2100_s3 + $0xa0] sm:$0xff]   ;;  %v1742_v4 = vld [vmem:[%s2100_s3 + $0xf0] sm:$0xff]   ;;  %s197_s19 = scalar_lea.vmem %s2101_s4, %s1476_s25 }
  0x10   : > { %v1838_v6 = vld [vmem:[%s192_s30] sm:$0xff]  ;;  %v1840_v7 = vld [vmem:[%s192_s30 + $0x8] sm:$0xff]  ;;  %1544 = vmatprep.subr.bf16.mxu0 %v1772_v1  ;;  %1578 = vmatprep.subr.bf16.mxu1 %v1772_v1 }
  0x11   : > { %v209_v8 = vmul.f32 %v1318_v3, %v1838_v6  ;;  %v210_v9 = vmul.f32 %v1318_v3, %v1840_v7  ;;  %v1740_v2 = vld [vmem:[%s2100_s3 + $0xe0] sm:$0xff]   ;;  %v1741_v3 = vld [vmem:[%s2100_s3 + $0xe8] sm:$0xff]  }
  0x12   : > { %v1748_v33 = vld [vmem:[%s2100_s3 + $0x100] sm:$0xff]  }
  0x13   : > { %v216_v11 = vadd.f32 %v1319_v5, %v209_v8  ;;  %v217_v12 = vadd.f32 %v1319_v5, %v210_v9  ;;  %1545 = vmatpush3.bf16.msra.mxu0 %v1719_v10  ;;  %1579 = vmatpush3.bf16.msra.mxu1 %v1730_v34  ;;  %v1743_v5 = vld [vmem:[%s2100_s3 + $0xf8] sm:$0xff]  }
  0x14   : > { %1550 = vmatprep.subr.bf16.mxu0 %v1772_v1  ;;  %1580 = vmatprep.subr.bf16.mxu1 %v1772_v1 }
  0x15   : > { %v218_v13 = vmax.f32 %v216_v11, 0.0  ;;  %v219_v14 = vmax.f32 %v217_v12, 0.0  ;;  %v1392_v11 = vld [vmem:[%s2098_s1 + $0x2] ss:$0 sm:$0xff] }
  0x17   : > { %221 = vst.msk [vmem:[#allocation2 + $0x1] sm:$0xff] %vm220_vm2, %v218_v13  ;;  %222 = vst.msk [vmem:[#allocation2 + $0x9] sm:$0xff] %vm220_vm2, %v219_v14  ;;  %1581 = vmatpush3.bf16.msra.mxu1 %v1731_v35  ;;  %v1749_v35 = vld [vmem:[%s2100_s3 + $0x108] sm:$0xff]  }
  0x18   : > { %1586 = vmatprep.subr.bf16.mxu1 %v1772_v1 }
  0x1e   : > { %v234_v15 = vld [vmem:[#allocation2 + $0x1] sm:$0xff]  ;;  %v235_v16 = vld [vmem:[#allocation2 + $0x9] sm:$0xff] }
  0x1f   : > { %v236_v18 = vpack.c.bf16 %v235_v16, %v234_v15  ;;  %v223_v22 = vld [vmem:[#allocation2] sm:$0xff]  ;;  %v224_v23 = vld [vmem:[#allocation2 + $0x8] sm:$0xff] }
  0x20   : > { %v225_v25 = vpack.c.bf16 %v224_v23, %v223_v22  ;;  %v382_v29 = vld [vmem:[#allocation2 + $0x2] sm:$0xff]  ;;  %v383_v30 = vld [vmem:[#allocation2 + $0xa] sm:$0xff] }
  0x21   : > { %1547 = vmatmul.mubr.msk.bf16.vlgmr.msra.gmra.mrb[0].mxu0 %vm220_vm2, %v236_v18  ;;  %v384_v31 = vpack.c.bf16 %v383_v30, %v382_v29  ;;  %v1393_v16 = vld [vmem:[%s2099_s2 + $0x2] ss:$0 sm:$0xff]  ;;  %v1746_v29 = vld [vmem:[%s2100_s3 + $0xd0] sm:$0xff]   ;;  %v1747_v30 = vld [vmem:[%s2100_s3 + $0xd8] sm:$0xff]  }
  0x22   : > { %1551 = vmatpush3.bf16.msra.mxu0 %v1720_v17  ;;  %1558 = vmatprep.mubr.msk.bf16.mxu0 %vm1773_vm0, %v1772_v1 }
  0x23   : > { %1552 = vmatprep.subr.bf16.mxu0 %v1772_v1 }
  0x26   : > { %1553 = vmatpush3.bf16.msra.mxu0 %v1721_v19 }
  0x27   : > { %1554 = vmatprep.subr.bf16.mxu0 %v1772_v1 }
  0x2a   : > { %1555 = vmatpush3.bf16.msra.mxu0 %v1722_v20 }
  0x2b   : > { %1556 = vmatprep.subr.bf16.mxu0 %v1772_v1 }
  0x2e   : > { %1557 = vmatpush3.bf16.msra.mxu0 %v1723_v21 }
  0x2f   : > { %1562 = vmatprep.subr.bf16.mxu0 %v1772_v1 }
  0x31   : > { %1559 = vmatmul.mubr.msk.bf16.vlgmr.msra.gmra.mrb[0].mxu0 %vm220_vm2, %v225_v25 }
  0x32   : > { %1563 = vmatpush3.bf16.msra.mxu0 %v1724_v24  ;;  %1570 = vmatprep.mubr.msk.bf16.mxu0 %vm1773_vm0, %v1772_v1 }
  0x33   : > { %1564 = vmatprep.subr.bf16.mxu0 %v1772_v1 }
  0x36   : > { %1565 = vmatpush3.bf16.msra.mxu0 %v1725_v26  ;;  %v1744_v26 = vld [vmem:[%s2100_s3 + $0xc0] sm:$0xff]  }
  0x37   : > { %1566 = vmatprep.subr.bf16.mxu0 %v1772_v1 }
  0x3a   : > { %1567 = vmatpush3.bf16.msra.mxu0 %v1726_v27 }
  0x3b   : > { %1568 = vmatprep.subr.bf16.mxu0 %v1772_v1 }
  0x3e   : > { %1569 = vmatpush3.bf16.msra.mxu0 %v1727_v28  ;;  %v1745_v28 = vld [vmem:[%s2100_s3 + $0xc8] sm:$0xff]  }
  0x3f   : > { %1610 = vmatprep.subr.bf16.mxu0 %v1772_v1 }
  0x41   : > { %1571 = vmatmul.mubr.msk.bf16.vlgmr.msra.gmra.mrb[0].mxu0 %vm220_vm2, %v384_v31 }
  0x42   : > { %1618 = vmatprep.mubr.msk.bf16.mxu0 %vm1773_vm0, %v1772_v1  ;;  %1611 = vmatpush3.bf16.msra.mxu0 %v1740_v2 }
  0x43   : > { %1612 = vmatprep.subr.bf16.mxu0 %v1772_v1 }
  0x46   : > { %1613 = vmatpush3.bf16.msra.mxu0 %v1741_v3  ;;  %v1760_v3 = vld [vmem:[%s2100_s3 + $0x160] sm:$0xff]  }
  0x47   : > { %1614 = vmatprep.subr.bf16.mxu0 %v1772_v1 }
  0x4a   : > { %1615 = vmatpush3.bf16.msra.mxu0 %v1742_v4 }
  0x4b   : > { %1616 = vmatprep.subr.bf16.mxu0 %v1772_v1 }
  0x4e   : > { %1617 = vmatpush3.bf16.msra.mxu0 %v1743_v5  ;;  %v1761_v5 = vld [vmem:[%s2100_s3 + $0x168] sm:$0xff]  }
  0x4f   : > { %1622 = vmatprep.subr.bf16.mxu0 %v1772_v1 }
 0x114   : > { %v455_v37 = vpop.f32.mrb[0].mxu0 }
 0x115   : > { %v469_v39 = vmul.f32 %v1351_v36, %v455_v37  ;;  %v1572_v40 = vpop.f32.mrb[1].mxu0  ;;  %v1751_v37 = vld [vmem:[%s2100_s3 + $0x118] sm:$0xff]  }
 0x116   : > { %v458_v41 = vpop.f32.mrb[2].mxu0 }
 0x117   : > { %v476_v42 = vadd.f32 %v1352_v38, %v469_v39  ;;  %v470_v43 = vmul.f32 %v1351_v36, %v458_v41  ;;  %v1573_v44 = vpop.f32.mrb[3].mxu0  ;;  %v1750_v36 = vld [vmem:[%s2100_s3 + $0x110] sm:$0xff]   ;;  %v1752_v41 = vld [vmem:[%s2100_s3 + $0x140] sm:$0xff]  }
 0x118   : > { %v1755_v44 = vld [vmem:[%s2100_s3 + $0x158] sm:$0xff]  }
 0x119   : > { %v478_v45 = vmax.f32 %v476_v42, 0.0  ;;  %v477_v46 = vadd.f32 %v1352_v38, %v470_v43  ;;  %v1753_v42 = vld [vmem:[%s2100_s3 + $0x148] sm:$0xff]   ;;  %v1754_v43 = vld [vmem:[%s2100_s3 + $0x150] sm:$0xff]  }
 0x11b   : > { %480 = vst.msk [vmem:[#allocation2 + $0x1] sm:$0xff] %vm220_vm2, %v478_v45  ;;  %v479_v47 = vmax.f32 %v477_v46, 0.0  ;;  %v1433_v45 = vld [vmem:[%s2098_s1 + $0x3] ss:$0 sm:$0xff] }
 0x11d   : > { %481 = vst.msk [vmem:[#allocation2 + $0x9] sm:$0xff] %vm220_vm2, %v479_v47  ;;  %v1434_v47 = vld [vmem:[%s2099_s2 + $0x3] ss:$0 sm:$0xff] }
 0x122   : > { %v494_v48 = vld [vmem:[#allocation2 + $0x1] sm:$0xff] }
 0x123   : > { %v482_v56 = vld [vmem:[#allocation2] sm:$0xff] }
 0x124   : > { %v495_v49 = vld [vmem:[#allocation2 + $0x9] sm:$0xff] }
 0x125   : > { %v496_v51 = vpack.c.bf16 %v495_v49, %v494_v48  ;;  %v483_v55 = vld [vmem:[#allocation2 + $0x8] sm:$0xff] }
 0x126   : > { %v484_v58 = vpack.c.bf16 %v483_v55, %v482_v56  ;;  %v642_v62 = vld [vmem:[#allocation2 + $0x2] sm:$0xff]  ;;  %v643_v63 = vld [vmem:[#allocation2 + $0xa] sm:$0xff] }
 0x127   : > { %1583 = vmatmul.mubr.msk.bf16.vlgmr.msra.gmra.mrb[0].mxu1 %vm220_vm2, %v496_v51  ;;  %v644_v0 = vpack.c.bf16 %v643_v63, %v642_v62  ;;  %v1758_v62 = vld [vmem:[%s2100_s3 + $0x130] sm:$0xff]   ;;  %v1759_v63 = vld [vmem:[%s2100_s3 + $0x138] sm:$0xff]  }
 0x128   : > { %1587 = vmatpush3.bf16.msra.mxu1 %v1732_v50  ;;  %1594 = vmatprep.mubr.msk.bf16.mxu1 %vm1773_vm0, %v1772_v1 }
 0x129   : > { %1588 = vmatprep.subr.bf16.mxu1 %v1772_v1 }
 0x12c   : > { %1589 = vmatpush3.bf16.msra.mxu1 %v1733_v52 }
 0x12d   : > { %1590 = vmatprep.subr.bf16.mxu1 %v1772_v1 }
 0x130   : > { %1591 = vmatpush3.bf16.msra.mxu1 %v1734_v53 }
 0x131   : > { %1592 = vmatprep.subr.bf16.mxu1 %v1772_v1 }
 0x134   : > { %1593 = vmatpush3.bf16.msra.mxu1 %v1735_v54 }
 0x135   : > { %1598 = vmatprep.subr.bf16.mxu1 %v1772_v1 }
 0x137   : > { %1595 = vmatmul.mubr.msk.bf16.vlgmr.msra.gmra.mrb[0].mxu1 %vm220_vm2, %v484_v58 }
 0x138   : > { %1599 = vmatpush3.bf16.msra.mxu1 %v1736_v57  ;;  %1606 = vmatprep.mubr.msk.bf16.mxu1 %vm1773_vm0, %v1772_v1 }
 0x139   : > { %1600 = vmatprep.subr.bf16.mxu1 %v1772_v1 }
 0x13c   : > { %1601 = vmatpush3.bf16.msra.mxu1 %v1737_v59  ;;  %v1756_v59 = vld [vmem:[%s2100_s3 + $0x120] sm:$0xff]  }
 0x13d   : > { %1602 = vmatprep.subr.bf16.mxu1 %v1772_v1 }
 0x140   : > { %1603 = vmatpush3.bf16.msra.mxu1 %v1738_v60 }
 0x141   : > { %1604 = vmatprep.subr.bf16.mxu1 %v1772_v1 }
 0x144   : > { %1605 = vmatpush3.bf16.msra.mxu1 %v1739_v61  ;;  %v1757_v61 = vld [vmem:[%s2100_s3 + $0x128] sm:$0xff]  }
 0x145   : > { %1646 = vmatprep.subr.bf16.mxu1 %v1772_v1 }
 0x147   : > { %1607 = vmatmul.mubr.msk.bf16.vlgmr.msra.gmra.mrb[0].mxu1 %vm220_vm2, %v644_v0 }
 0x148   : > { %1654 = vmatprep.mubr.msk.bf16.mxu1 %vm1773_vm0, %v1772_v1  ;;  %1647 = vmatpush3.bf16.msra.mxu1 %v1752_v41 }
 0x149   : > { %1648 = vmatprep.subr.bf16.mxu1 %v1772_v1 }
 0x14c   : > { %1649 = vmatpush3.bf16.msra.mxu1 %v1753_v42 }
 0x14d   : > { %1650 = vmatprep.subr.bf16.mxu1 %v1772_v1 }
 0x150   : > { %1651 = vmatpush3.bf16.msra.mxu1 %v1754_v43 }
 0x151   : > { %1652 = vmatprep.subr.bf16.mxu1 %v1772_v1 }
 0x154   : > { %1653 = vmatpush3.bf16.msra.mxu1 %v1755_v44 }
 0x155   : > { %1658 = vmatprep.subr.bf16.mxu1 %v1772_v1 }
 0x21a   : > { %v715_v8 = vpop.f32.mrb[0].mxu1 }
 0x21b   : > { %v724_v9 = vmul.f32 0.5, %v715_v8  ;;  %v1608_v10 = vpop.f32.mrb[1].mxu1  ;;  %v1762_v8 = vld [vmem:[%s2100_s3 + $0x170] sm:$0xff]  }
 0x21c   : > { %v718_v12 = vpop.f32.mrb[2].mxu1 }
 0x21d   : > { %v726_v13 = vadd.f32 %v724_v9, %v1838_v6  ;;  %v725_v14 = vmul.f32 0.5, %v718_v12  ;;  %v1609_v15 = vpop.f32.mrb[3].mxu1  ;;  %v1763_v9 = vld [vmem:[%s2100_s3 + $0x178] sm:$0xff]  }
 0x21f   : > { %v733_v17 = vmul.f32 %v1392_v11, %v726_v13  ;;  %v727_v18 = vadd.f32 %v725_v14, %v1840_v7 }
 0x221   : > { %v740_v19 = vadd.f32 %v1393_v16, %v733_v17  ;;  %v734_v20 = vmul.f32 %v1392_v11, %v727_v18 }
 0x223   : > { %v742_v21 = vmax.f32 %v740_v19, 0.0  ;;  %v741_v22 = vadd.f32 %v1393_v16, %v734_v20 }
 0x225   : > { %744 = vst.msk [vmem:[#allocation2 + $0x1] sm:$0xff] %vm220_vm2, %v742_v21  ;;  %v743_v23 = vmax.f32 %v741_v22, 0.0 }
 0x227   : > { %745 = vst.msk [vmem:[#allocation2 + $0x9] sm:$0xff] %vm220_vm2, %v743_v23 }
 0x22c   : > { %v758_v24 = vld [vmem:[#allocation2 + $0x1] sm:$0xff] }
 0x22d   : > { %v746_v32 = vld [vmem:[#allocation2] sm:$0xff] }
 0x22e   : > { %v759_v25 = vld [vmem:[#allocation2 + $0x9] sm:$0xff] }
 0x22f   : > { %v760_v27 = vpack.c.bf16 %v759_v25, %v758_v24  ;;  %v747_v31 = vld [vmem:[#allocation2 + $0x8] sm:$0xff] }
 0x230   : > { %v748_v34 = vpack.c.bf16 %v747_v31, %v746_v32  ;;  %v906_v38 = vld [vmem:[#allocation2 + $0x2] sm:$0xff]  ;;  %v907_v39 = vld [vmem:[#allocation2 + $0xa] sm:$0xff] }
 0x231   : > { %1619 = vmatmul.mubr.msk.bf16.vlgmr.msra.gmra.mrb[4].mxu0 %vm220_vm2, %v760_v27  ;;  %v908_v40 = vpack.c.bf16 %v907_v39, %v906_v38 }
 0x232   : > { %1623 = vmatpush3.bf16.msra.mxu0 %v1744_v26  ;;  %1630 = vmatprep.mubr.msk.bf16.mxu0 %vm1773_vm0, %v1772_v1 }
 0x233   : > { %1624 = vmatprep.subr.bf16.mxu0 %v1772_v1 }
 0x236   : > { %1625 = vmatpush3.bf16.msra.mxu0 %v1745_v28 }
 0x237   : > { %1626 = vmatprep.subr.bf16.mxu0 %v1772_v1 }
 0x23a   : > { %1627 = vmatpush3.bf16.msra.mxu0 %v1746_v29 }
 0x23b   : > { %1628 = vmatprep.subr.bf16.mxu0 %v1772_v1 }
 0x23e   : > { %1629 = vmatpush3.bf16.msra.mxu0 %v1747_v30 }
 0x23f   : > { %1634 = vmatprep.subr.bf16.mxu0 %v1772_v1 }
 0x241   : > { %1631 = vmatmul.mubr.msk.bf16.vlgmr.msra.gmra.mrb[4].mxu0 %vm220_vm2, %v748_v34 }
 0x242   : > { %1635 = vmatpush3.bf16.msra.mxu0 %v1748_v33  ;;  %1642 = vmatprep.mubr.msk.bf16.mxu0 %vm1773_vm0, %v1772_v1 }
 0x243   : > { %1636 = vmatprep.subr.bf16.mxu0 %v1772_v1 }
 0x246   : > { %1637 = vmatpush3.bf16.msra.mxu0 %v1749_v35 }
 0x247   : > { %1638 = vmatprep.subr.bf16.mxu0 %v1772_v1 }
 0x24a   : > { %1639 = vmatpush3.bf16.msra.mxu0 %v1750_v36 }
 0x24b   : > { %1640 = vmatprep.subr.bf16.mxu0 %v1772_v1 }
 0x24e   : > { %1641 = vmatpush3.bf16.msra.mxu0 %v1751_v37 }
 0x251   : > { %1643 = vmatmul.mubr.msk.bf16.vlgmr.msra.gmra.mrb[4].mxu0 %vm220_vm2, %v908_v40 }
 0x324   : > { %v979_v46 = vpop.f32.mrb[4].mxu0 }
 0x325   : > { %v993_v48 = vmul.f32 %v1433_v45, %v979_v46  ;;  %v1644_v49 = vpop.f32.mrb[5].mxu0 }
 0x326   : > { %v982_v50 = vpop.f32.mrb[6].mxu0 }
 0x327   : > { %v1000_v51 = vadd.f32 %v1434_v47, %v993_v48  ;;  %v994_v52 = vmul.f32 %v1433_v45, %v982_v50  ;;  %v1645_v53 = vpop.f32.mrb[7].mxu0 }
 0x329   : > { %v1002_v54 = vmax.f32 %v1000_v51, 0.0  ;;  %v1001_v55 = vadd.f32 %v1434_v47, %v994_v52 }
 0x32b   : > { %1004 = vst.msk [vmem:[#allocation2 + $0x1] sm:$0xff] %vm220_vm2, %v1002_v54  ;;  %v1003_v56 = vmax.f32 %v1001_v55, 0.0 }
 0x32d   : > { %1005 = vst.msk [vmem:[#allocation2 + $0x9] sm:$0xff] %vm220_vm2, %v1003_v56 }
 0x332   : > { %v1018_v57 = vld [vmem:[#allocation2 + $0x1] sm:$0xff] }
 0x333   : > { %v1006_v2 = vld [vmem:[#allocation2] sm:$0xff] }
 0x334   : > { %v1019_v58 = vld [vmem:[#allocation2 + $0x9] sm:$0xff] }
 0x335   : > { %v1020_v60 = vpack.c.bf16 %v1019_v58, %v1018_v57  ;;  %v1007_v0 = vld [vmem:[#allocation2 + $0x8] sm:$0xff] }
 0x336   : > { %v1008_v4 = vpack.c.bf16 %v1007_v0, %v1006_v2  ;;  %v1166_v10 = vld [vmem:[#allocation2 + $0x2] sm:$0xff]  ;;  %v1167_v11 = vld [vmem:[#allocation2 + $0xa] sm:$0xff] }
 0x337   : > { %1655 = vmatmul.mubr.msk.bf16.vlgmr.msra.gmra.mrb[4].mxu1 %vm220_vm2, %v1020_v60  ;;  %v1168_v12 = vpack.c.bf16 %v1167_v11, %v1166_v10 }
 0x338   : > { %1659 = vmatpush3.bf16.msra.mxu1 %v1756_v59  ;;  %1666 = vmatprep.mubr.msk.bf16.mxu1 %vm1773_vm0, %v1772_v1 }
 0x339   : > { %1660 = vmatprep.subr.bf16.mxu1 %v1772_v1 }
 0x33c   : > { %1661 = vmatpush3.bf16.msra.mxu1 %v1757_v61 }
 0x33d   : > { %1662 = vmatprep.subr.bf16.mxu1 %v1772_v1 }
 0x340   : > { %1663 = vmatpush3.bf16.msra.mxu1 %v1758_v62 }
 0x341   : > { %1664 = vmatprep.subr.bf16.mxu1 %v1772_v1 }
 0x344   : > { %1665 = vmatpush3.bf16.msra.mxu1 %v1759_v63 }
 0x345   : > { %1670 = vmatprep.subr.bf16.mxu1 %v1772_v1 }
 0x347   : > { %1667 = vmatmul.mubr.msk.bf16.vlgmr.msra.gmra.mrb[8].mxu1 %vm220_vm2, %v1008_v4 }
 0x348   : > { %1671 = vmatpush3.bf16.msra.mxu1 %v1760_v3  ;;  %1678 = vmatprep.mubr.msk.bf16.mxu1 %vm1773_vm0, %v1772_v1 }
 0x349   : > { %1672 = vmatprep.subr.bf16.mxu1 %v1772_v1 }
 0x34c   : > { %1673 = vmatpush3.bf16.msra.mxu1 %v1761_v5 }
 0x34d   : > { %1674 = vmatprep.subr.bf16.mxu1 %v1772_v1 }
 0x350   : > { %1675 = vmatpush3.bf16.msra.mxu1 %v1762_v8 }
 0x351   : > { %1676 = vmatprep.subr.bf16.mxu1 %v1772_v1 }
 0x354   : > { %1677 = vmatpush3.bf16.msra.mxu1 %v1763_v9 }
 0x357   : > { %1679 = vmatmul.mubr.msk.bf16.vlgmr.msra.gmra.mrb[12].mxu1 %vm220_vm2, %v1168_v12 }
 0x40a   : > { %v1091_v13 = vpop.f32.mrb[4].mxu1 }
 0x40b   : > { %v1656_v14 = vpop.f32.mrb[5].mxu1 }
 0x40c   : > { %v1094_v15 = vpop.f32.mrb[6].mxu1 }
 0x40d   : > { %v1657_v16 = vpop.f32.mrb[7].mxu1 }
 0x41a   : > { %v1159_v17 = vpop.f32.mrb[8].mxu1 }
 0x41b   : > { %v1160_v18 = vadd.f32 %v1159_v17, %v1091_v13  ;;  %v1668_v19 = vpop.f32.mrb[9].mxu1 }
 0x41c   : > { %v1162_v20 = vpop.f32.mrb[10].mxu1 }
 0x41d   : > { %v1163_v21 = vadd.f32 %v1162_v20, %v1094_v15  ;;  %v1669_v22 = vpop.f32.mrb[11].mxu1 }
 0x42a   : > { %v1239_v23 = vpop.f32.mrb[12].mxu1 }
 0x42b   : > { %v1246_v24 = vadd.f32 %v1239_v23, %v1160_v18  ;;  %v1680_v1 = vpop.f32.mrb[13].mxu1 }
 0x42c   : > { %v1242_v25 = vpop.f32.mrb[14].mxu1 }
 0x42d   : > { %v1248_v26 = vadd.f32 %v1246_v24, %v1838_v6  ;;  %v1247_v27 = vadd.f32 %v1242_v25, %v1163_v21  ;;  %v1681_v28 = vpop.f32.mrb[15].mxu1 }
 0x42f   : > { %v1250_v29 = vmax.f32 %v1248_v26, 0.0  ;;  %v1249_v30 = vadd.f32 %v1247_v27, %v1840_v7 }
 0x431   : > { %1252 = vst.msk [vmem:[%s197_s19] sm:$0xff] %vm220_vm2, %v1250_v29  ;;  %v1251_v31 = vmax.f32 %v1249_v30, 0.0 }
 0x433   : > { %1253 = vst.msk [vmem:[%s197_s19 + $0x8] sm:$0xff] %vm220_vm2, %v1251_v31 }
 0x434 PF: > { %s14_s15 = sadd.s32 1, %s1770_s15  }
 0x435   : > { %p11_p4 = scmp.ge.s32.totalorder %s14_s15, 4  }
 0x437   :  { %13 = sbr.rel (!%p11_p4) target bundleno = 1 (0x1), region = 77 }

</bundles_post_ra>
